<compile_context>
chip_gen: v6e
topology: v6e:2x2x1
jax: 0.10.0
libtpu: 0.0.40
codegen_flags: <defaults>
</compile_context>

<pallas_src>
import math

import jax
import jax.numpy as jnp
from jax.experimental import pallas as pl
from jax.experimental.pallas import tpu as pltpu


# --------------------------------------------------------------------------
# helpers
# --------------------------------------------------------------------------
def _round_up(x, m):
    return ((x + m - 1) // m) * m


def _sublane_multiple(dtype):
    itemsize = jnp.dtype(dtype).itemsize
    return {4: 8, 2: 16, 1: 32}.get(itemsize, 8)


def _nbytes(shape, dtype):
    return math.prod(shape) * jnp.dtype(dtype).itemsize


def _vmem_budget_bytes():
    """~80% of physical per-core VMEM (v5e/v6e: ~102 MiB, v7x: ~51 MiB)."""
    try:
        cap = pltpu.get_tpu_info().vmem_capacity_bytes
    except Exception:
        cap = 64 * 1024 * 1024  # conservative fallback (v7x per-TC size)
    return int(cap * 0.8)


def _bias_gelu(h_f32, b1, target_dtype):
    """bias-add + GELU on the f32 fc1 output; returns activation in the fc2
    weight dtype (so bf16 weights feed the bf16 MXU path)."""
    h = h_f32 + b1.astype(jnp.float32)
    if jnp.dtype(target_dtype) == jnp.bfloat16:
        # bf16 VPU + tanh-approx GELU (EUP) on v6e/v7x; within bf16 roundoff
        # of torch's exact erf GELU.
        return jax.nn.gelu(h.astype(jnp.bfloat16), approximate=True)
    # exact erf GELU in f32 (matches torch.nn.GELU default; v5e-safe).
    h = 0.5 * h * (1.0 + jax.lax.erf(h * (1.0 / math.sqrt(2.0))))
    return h.astype(target_dtype)


# --------------------------------------------------------------------------
# kernels
# --------------------------------------------------------------------------
def _mlp_resident_kernel(x_ref, w1t_ref, b1_ref, w2t_ref, b2_ref, o_ref):
    """Weights fully VMEM-resident; grid = (row tiles,). No scratch needed."""
    x = x_ref[...].astype(w1t_ref.dtype)
    h = jnp.dot(x, w1t_ref[...], preferred_element_type=jnp.float32)
    h = _bias_gelu(h, b1_ref[...], w2t_ref.dtype)
    y = jnp.dot(h, w2t_ref[...], preferred_element_type=jnp.float32)
    # TODO(synk): Dropout with drop=0.0 is the identity; non-zero drop would
    # need pltpu.prng_seed / pltpu.prng_random_bits for a mask.
    o_ref[...] = (y + b2_ref[...].astype(jnp.float32)).astype(o_ref.dtype)


def _mlp_streamed_kernel(x_ref, w1t_ref, b1_ref, w2t_ref, b2_ref, o_ref,
                         acc_ref):
    """Weights streamed over the hidden axis; grid = (row tiles, hidden tiles).

    Each hidden step computes GELU(fc1) for one hidden slice and adds its fc2
    partial product into a resident f32 VMEM accumulator.  The first step
    stores directly (no zero-fill + add pass); the last step finalizes.
    """
    k = pl.program_id(1)

    x = x_ref[...].astype(w1t_ref.dtype)
    h = jnp.dot(x, w1t_ref[...], preferred_element_type=jnp.float32)
    h = _bias_gelu(h, b1_ref[...], w2t_ref.dtype)
    part = jnp.dot(h, w2t_ref[...], preferred_element_type=jnp.float32)

    @pl.when(k == 0)
    def _():
        acc_ref[...] = part

    @pl.when(k > 0)
    def _():
        acc_ref[...] += part

    @pl.when(k == pl.num_programs(1) - 1)
    def _():
        o_ref[...] = (acc_ref[...] + b2_ref[...].astype(jnp.float32)
                      ).astype(o_ref.dtype)


# --------------------------------------------------------------------------
# wrapper
# --------------------------------------------------------------------------
def mlp_pallas(x, w1t, b1, w2t, b2, *, row_tile=None, hidden_tile=None,
               force_stream=False):
    """y = fc2(GELU(fc1(x))), drop=0.0.

    x   : (B, N, C_in)
    w1t : (C_in, H)   fc1 weight, stored pre-transposed
    b1  : (H,)
    w2t : (H, C_out)  fc2 weight, stored pre-transposed
    b2  : (C_out,)
    """
    B, N, C_in = x.shape
    assert w1t.shape[0] == C_in
    H = w1t.shape[1]
    assert w2t.shape[0] == H
    C_out = w2t.shape[1]
    M = B * N

    x2d = x.reshape(M, C_in)
    b1r = b1.reshape(1, H)
    b2r = b2.reshape(1, C_out)

    sub = max(_sublane_multiple(x.dtype), _sublane_multiple(w1t.dtype))
    vmem_budget = _vmem_budget_bytes()

    # --- can both weight matrices stay VMEM-resident (double-buffered)?
    resident_weight_bytes = 2 * (_nbytes((C_in, H), w1t.dtype)
                                 + _nbytes((H, C_out), w2t.dtype)
                                 + _nbytes((1, H), b1.dtype)
                                 + _nbytes((1, C_out), b2.dtype))
    weights_resident = (not force_stream) and \
        (resident_weight_bytes <= vmem_budget // 2)

    # --- row tile selection (shared): big tiles keep the MXU busy; round to
    # the dtype-dependent sublane multiple; split into >= 2 tiles so the
    # "parallel" row axis shards across v7x's two TensorCores.
    if row_tile is None:
        row_tile = 512
    tm = _round_up(min(row_tile, _round_up(M, sub)), sub)
    if pl.cdiv(M, tm) < 2 and M > sub:
        tm = _round_up(pl.cdiv(M, 2), sub)

    if weights_resident:
        def tile_bytes(tm_):
            return (2 * _nbytes((tm_, C_in), x.dtype)
                    + 2 * _nbytes((tm_, C_out), x.dtype))

        avail = vmem_budget - resident_weight_bytes
        while tm > sub and tile_bytes(tm) > avail:
            tm = max(sub, _round_up(tm // 2, sub))

        grid = (pl.cdiv(M, tm),)
        out2d = pl.pallas_call(
            _mlp_resident_kernel,
            out_shape=jax.ShapeDtypeStruct((M, C_out), x.dtype),
            grid_spec=pltpu.PrefetchScalarGridSpec(
                num_scalar_prefetch=0,
                grid=grid,
                in_specs=[
                    pl.BlockSpec((tm, C_in), lambda i: (i, 0)),   # x row tile
                    pl.BlockSpec((C_in, H), lambda i: (0, 0)),    # W1^T (resident)
                    pl.BlockSpec((1, H), lambda i: (0, 0)),       # b1   (resident)
                    pl.BlockSpec((H, C_out), lambda i: (0, 0)),   # W2^T (resident)
                    pl.BlockSpec((1, C_out), lambda i: (0, 0)),   # b2   (resident)
                ],
                out_specs=pl.BlockSpec((tm, C_out), lambda i: (i, 0)),
            ),
            compiler_params=pltpu.CompilerParams(
                dimension_semantics=("parallel",),
                vmem_limit_bytes=int(vmem_budget),
            ),
        )(x2d, w1t, b1r, w2t, b2r)
        return out2d.reshape(B, N, C_out)

    # --- streamed-weight path (large H): tile the hidden axis.
    def pick_hidden_tile(cap):
        cap = min(cap, H)
        cands = [c for c in range(128, cap + 1, 128) if H % c == 0]
        if cands:
            return max(cands)
        # TODO(synk): pad H / zero-pad weight slices for H not divisible by 128.
        return H

    if hidden_tile is None:
        hidden_tile = 512
    th = pick_hidden_tile(hidden_tile)

    def step_bytes(tm_, th_):
        return (2 * (_nbytes((tm_, C_in), x.dtype)
                     + _nbytes((C_in, th_), w1t.dtype)
                     + _nbytes((1, th_), b1.dtype)
                     + _nbytes((th_, C_out), w2t.dtype)
                     + _nbytes((1, C_out), b2.dtype)
                     + _nbytes((tm_, C_out), x.dtype))
                + _nbytes((tm_, C_out), jnp.float32))

    while step_bytes(tm, th) > vmem_budget:
        if th > 128:
            new_th = pick_hidden_tile(th - 128)
            if new_th < th:
                th = new_th
                continue
        if tm > sub:
            tm = max(sub, _round_up(tm // 2, sub))
            continue
        break  # smallest legal tiling; let the compiler cope.

    grid = (pl.cdiv(M, tm), H // th)

    out2d = pl.pallas_call(
        _mlp_streamed_kernel,
        out_shape=jax.ShapeDtypeStruct((M, C_out), x.dtype),
        grid_spec=pltpu.PrefetchScalarGridSpec(
            num_scalar_prefetch=0,
            grid=grid,
            in_specs=[
                pl.BlockSpec((tm, C_in), lambda i, k: (i, 0)),    # x row tile
                pl.BlockSpec((C_in, th), lambda i, k: (0, k)),    # W1^T slice
                pl.BlockSpec((1, th), lambda i, k: (0, k)),       # b1 slice
                pl.BlockSpec((th, C_out), lambda i, k: (k, 0)),   # W2^T slice
                pl.BlockSpec((1, C_out), lambda i, k: (0, 0)),    # b2 (invariant)
            ],
            out_specs=pl.BlockSpec((tm, C_out), lambda i, k: (i, 0)),
            scratch_shapes=[pltpu.VMEM((tm, C_out), jnp.float32)],
        ),
        compiler_params=pltpu.CompilerParams(
            dimension_semantics=("parallel", "arbitrary"),
            vmem_limit_bytes=int(vmem_budget),
        ),
    )(x2d, w1t, b1r, w2t, b2r)
    return out2d.reshape(B, N, C_out)


# --------------------------------------------------------------------------
# parameter init + pure-JAX reference
# --------------------------------------------------------------------------
def init_mlp_params(key, in_features, hidden_features, out_features,
                    dtype=jnp.float32):
    """torch.nn.Linear-style init (uniform(+-1/sqrt(fan_in))); weights are
    returned PRE-TRANSPOSED ((C_in,H), (H,C_out)) so the forward pass never
    materializes a transpose."""
    k1, k2, k3, k4 = jax.random.split(key, 4)
    bound1 = 1.0 / math.sqrt(in_features)
    bound2 = 1.0 / math.sqrt(hidden_features)
    w1 = jax.random.uniform(k1, (hidden_features, in_features), dtype,
                            minval=-bound1, maxval=bound1)
    b1 = jax.random.uniform(k2, (hidden_features,), dtype,
                            minval=-bound1, maxval=bound1)
    w2 = jax.random.uniform(k3, (out_features, hidden_features), dtype,
                            minval=-bound2, maxval=bound2)
    b2 = jax.random.uniform(k4, (out_features,), dtype,
                            minval=-bound2, maxval=bound2)
    return jnp.transpose(w1), b1, jnp.transpose(w2), b2


def mlp_reference(x, w1t, b1, w2t, b2):
    h = jnp.einsum("bnc,ch->bnh", x, w1t) + b1
    h = 0.5 * h * (1.0 + jax.lax.erf(h / math.sqrt(2.0)))
    return jnp.einsum("bnh,ho->bno", h, w2t) + b2


# --------------------------------------------------------------------------
# self-test
# --------------------------------------------------------------------------
if __name__ == "__main__":
    # Lane-aligned feature dims; B*N = 144 is intentionally NOT a multiple of
    # the streamed row tile to exercise Pallas's masked ragged-edge writeback
    # (no explicit pad/slice copies).
    B, N, C_in, H = 2, 72, 128, 256
    C_out = C_in  # out_features defaults to in_features

    key = jax.random.PRNGKey(0)
    kx, kp = jax.random.split(key)
    x = jax.random.normal(kx, (B, N, C_in), dtype=jnp.float32)
    w1t, b1, w2t, b2 = init_mlp_params(kp, C_in, H, C_out)

    y_ref = mlp_reference(x, w1t, b1, w2t, b2)

    # 1) resident-weight path (weights fit VMEM -> single row grid axis).
    y_res = mlp_pallas(x, w1t, b1, w2t, b2)
    jax.block_until_ready(y_res)
    assert y_res.shape == (B, N, C_out)
    assert jnp.allclose(y_res, y_ref, atol=1e-3, rtol=1e-3), \
        "resident path mismatch vs reference"

    # 2) streamed-weight path (hidden axis on the grid + f32 accumulator,
    #    ragged last row tile).
    y_str = mlp_pallas(x, w1t, b1, w2t, b2, row_tile=64, hidden_tile=128,
                       force_stream=True)
    jax.block_until_ready(y_str)
    assert jnp.allclose(y_str, y_ref, atol=1e-3, rtol=1e-3), \
        "streamed path mismatch vs reference"

    print("KERNEL_OK")
</pallas_src>

<mosaic_0001>
module attributes {stable_mosaic.version = 11 : i64} {
  func.func @_mlp_resident_kernel(%arg0: i32, %arg1: memref<72x128xf32, #tpu.memory_space<vmem>>, %arg2: memref<128x256xf32, #tpu.memory_space<vmem>>, %arg3: memref<1x256xf32, #tpu.memory_space<vmem>>, %arg4: memref<256x128xf32, #tpu.memory_space<vmem>>, %arg5: memref<1x128xf32, #tpu.memory_space<vmem>>, %arg6: memref<72x128xf32, #tpu.memory_space<vmem>>) attributes {dimension_semantics = [#tpu.dimension_semantics<parallel>], iteration_bounds = array<i64: 2>, scalar_prefetch = 0 : i64, scratch_operands = 0 : i64, tpu.core_type = #tpu.core_type<tc>, window_params = [{transform_indices = @transform_0, window_bounds = array<i64: 72, 128>}, {pipeline_mode = #tpu.pipeline_mode<synchronous>, transform_indices = @transform_1, window_bounds = array<i64: 128, 256>}, {pipeline_mode = #tpu.pipeline_mode<synchronous>, transform_indices = @transform_2, window_bounds = array<i64: 1, 256>}, {pipeline_mode = #tpu.pipeline_mode<synchronous>, transform_indices = @transform_3, window_bounds = array<i64: 256, 128>}, {pipeline_mode = #tpu.pipeline_mode<synchronous>, transform_indices = @transform_4, window_bounds = array<i64: 1, 128>}, {transform_indices = @transform_5, window_bounds = array<i64: 72, 128>}]} {
    %c0 = arith.constant 0 : index
    %c0_0 = arith.constant 0 : index
    %0 = vector.load %arg1[%c0, %c0_0] : memref<72x128xf32, #tpu.memory_space<vmem>>, vector<72x128xf32>
    %c0_1 = arith.constant 0 : index
    %c0_2 = arith.constant 0 : index
    %1 = vector.load %arg2[%c0_1, %c0_2] : memref<128x256xf32, #tpu.memory_space<vmem>>, vector<128x256xf32>
    %cst = arith.constant dense<0.000000e+00> : vector<72x256xf32>
    %2 = tpu.matmul %0, %1, %cst {dimension_numbers = #tpu.dot_dimension_numbers<[1], [0], [0], [1], [0, 0, 1, 1], [], []>} : vector<72x128xf32>, vector<128x256xf32>, vector<72x256xf32> -> vector<72x256xf32>
    %c0_3 = arith.constant 0 : index
    %c0_4 = arith.constant 0 : index
    %3 = vector.load %arg3[%c0_3, %c0_4] : memref<1x256xf32, #tpu.memory_space<vmem>>, vector<1x256xf32>
    %4 = vector.broadcast %3 : vector<1x256xf32> to vector<72x256xf32>
    %5 = arith.addf %2, %4 : vector<72x256xf32>
    %cst_5 = arith.constant 5.000000e-01 : f32
    %6 = vector.broadcast %cst_5 : f32 to vector<72x256xf32>
    %7 = arith.mulf %6, %5 : vector<72x256xf32>
    %cst_6 = arith.constant 0.707106769 : f32
    %8 = vector.broadcast %cst_6 : f32 to vector<72x256xf32>
    %9 = arith.mulf %5, %8 : vector<72x256xf32>
    %10 = math.erf %9 : vector<72x256xf32>
    %cst_7 = arith.constant 1.000000e+00 : f32
    %11 = vector.broadcast %cst_7 : f32 to vector<72x256xf32>
    %12 = arith.addf %11, %10 : vector<72x256xf32>
    %13 = arith.mulf %7, %12 : vector<72x256xf32>
    %c0_8 = arith.constant 0 : index
    %c0_9 = arith.constant 0 : index
    %14 = vector.load %arg4[%c0_8, %c0_9] : memref<256x128xf32, #tpu.memory_space<vmem>>, vector<256x128xf32>
    %cst_10 = arith.constant dense<0.000000e+00> : vector<72x128xf32>
    %15 = tpu.matmul %13, %14, %cst_10 {dimension_numbers = #tpu.dot_dimension_numbers<[1], [0], [0], [1], [0, 0, 1, 1], [], []>} : vector<72x256xf32>, vector<256x128xf32>, vector<72x128xf32> -> vector<72x128xf32>
    %c0_11 = arith.constant 0 : index
    %c0_12 = arith.constant 0 : index
    %16 = vector.load %arg5[%c0_11, %c0_12] : memref<1x128xf32, #tpu.memory_space<vmem>>, vector<1x128xf32>
    %17 = vector.broadcast %16 : vector<1x128xf32> to vector<72x128xf32>
    %18 = arith.addf %15, %17 : vector<72x128xf32>
    %c0_13 = arith.constant 0 : index
    %c0_14 = arith.constant 0 : index
    %19 = vector.load %arg6[%c0_13, %c0_14] : memref<72x128xf32, #tpu.memory_space<vmem>>, vector<72x128xf32>
    tpu.vector_store %arg6[%c0_13, %c0_14], %18 {strides = array<i32>} : memref<72x128xf32, #tpu.memory_space<vmem>>, vector<72x128xf32>,
    return
  }
  func.func @transform_0(%arg0: i32) -> (i32, i32) {
    %c0_i32 = arith.constant 0 : i32
    %c0_i32_0 = arith.constant 0 : i32
    return %arg0, %c0_i32 : i32, i32
  }
  func.func @transform_1(%arg0: i32) -> (i32, i32) {
    %c0_i32 = arith.constant 0 : i32
    %c0_i32_0 = arith.constant 0 : i32
    %c0_i32_1 = arith.constant 0 : i32
    return %c0_i32, %c0_i32_0 : i32, i32
  }
  func.func @transform_2(%arg0: i32) -> (i32, i32) {
    %c0_i32 = arith.constant 0 : i32
    %c0_i32_0 = arith.constant 0 : i32
    %c0_i32_1 = arith.constant 0 : i32
    return %c0_i32, %c0_i32_0 : i32, i32
  }
  func.func @transform_3(%arg0: i32) -> (i32, i32) {
    %c0_i32 = arith.constant 0 : i32
    %c0_i32_0 = arith.constant 0 : i32
    %c0_i32_1 = arith.constant 0 : i32
    return %c0_i32, %c0_i32_0 : i32, i32
  }
  func.func @transform_4(%arg0: i32) -> (i32, i32) {
    %c0_i32 = arith.constant 0 : i32
    %c0_i32_0 = arith.constant 0 : i32
    %c0_i32_1 = arith.constant 0 : i32
    return %c0_i32, %c0_i32_0 : i32, i32
  }
  func.func @transform_5(%arg0: i32) -> (i32, i32) {
    %c0_i32 = arith.constant 0 : i32
    %c0_i32_0 = arith.constant 0 : i32
    return %arg0, %c0_i32 : i32, i32
  }
}

</mosaic_0001>

<bundles_post_ra>
// kernel: tpu_custom_call.1
= control target key start
LH: loop header
LB: loop body
LE: loop exit
PB: predicated region body
PF: predicated region fallthrough
CT: control target
= control target key end

     0   :  { %10 = vsyncpa [#allocation3], 0  ;;  %s1471_s0 = inlined_call_operand.hbm [shape: f32[144,128], index: 0, kind: input, shape index: {}]   ;;  %s1472_s1 = inlined_call_operand.hbm [shape: f32[128,256], index: 1, kind: input, shape index: {}]   ;;  %s1473_s2 = inlined_call_operand.vmem [shape: f32[1,256], index: 2, kind: input, shape index: {}]   ;;  %s1474_s3 = inlined_call_operand.hbm [shape: f32[256,128], index: 3, kind: input, shape index: {}]   ;;  %s1475_s4 = inlined_call_operand.vmem [shape: f32[1,128], index: 4, kind: input, shape index: {}]   ;;  %s1476_s5 = inlined_call_operand.hbm [shape: f32[144,128], index: 5, kind: output, shape index: {}]  }
   0x1   :  { %12 = vsyncpa [#allocation3 + $0x1], 0 }
   0x2   :  { %13 = vsyncpa [#allocation6], 0 }
   0x3   :  { %14 = vsyncpa [#allocation4], 0 }
   0x4   :  { %16 = vsyncpa [#allocation4 + $0x1], 0  ;;  %s1177_s18 = smov 0   ;;  %s1179_s19 = smov 0  }
   0x5   :  { %s1181_s20 = smov 0   ;;  %s1183_s21 = smov 0  }
   0x6 LB: > { %s1198_s22 = sadd.s32 4294967295, %s1134_s21   ;;  %s800_s23 = sadd.s32 4294967294, %s1134_s21   ;;  %s1134_s21 = sphi %s1183_s21, %s1500_s21   ;;  %s1130_s20 = sphi %s1181_s20, %s1499_s20   ;;  %s1126_s19 = sphi %s1179_s19, %s1498_s19   ;;  %s1122_s18 = sphi %s1177_s18, %s1497_s18  }
   0x7   : > { %p42_p0 = scmp.ne.s32.totalorder %s1126_s19, %s1122_s18  ;;  %p1477_p1 = scmp.eq.s32.totalorder %s1198_s22, 0 }
   0x8   : > { %p156_p3 = scmp.eq.s32.totalorder %s800_s23, 1  ;;  %p801_p5 = scmp.ge.s32.totalorder %s1134_s21, 1 }
   0x9   : > { %p1207_p4 = por %p1477_p1, %p42_p0  ;;  %p163_p7 = scmp.lt.s32.totalorder %s1134_s21, 3 }
   0xa   : > { %p1212_p6 = por %p156_p3, %p42_p0  ;;  %s1136_s27 = smov [#allocation5]  }
   0xb   : > { %s1482_s24 = scalar_select %p1207_p4, 1, 0 }
   0xc   : > { %s1483_s25 = scalar_select %p1212_p6, 1, 0 }
   0xd   : > { %p1217_p8 = pnand %p801_p5, %p163_p7  ;;  %s175_s28 = sshll.u32 %s1136_s27, 4  ;;  %s176_s28 = int_to_ptr.vmem [resolvable:$true] %s175_s28 }
   0xe   : > { %s1137_s30 = smov [#allocation7]   ;;  %s997_s7 = scalar_lea.vmem %s176_s28, 4096 }
   0xf   : > { %s1484_s26 = scalar_select %p1217_p8, 1, 0 }
  0x10   : > { %p888_p9 = pneg %p1217_p8  ;;  %s191_s6 = sshll.u32 %s1137_s30, 4  ;;  %s192_s6 = int_to_ptr.vmem [resolvable:$true] %s191_s6 }
  0x11   : > { %p998_p13 = scmp.ne.s32.totalorder %s176_s28, %s997_s7  ;;  %p1005_p5 = scmp.lt.s32.totalorder %s176_s28, %s176_s28 }
  0x12   : > { %p1226_p11 = pnand %p888_p9, %p1477_p1  ;;  %p1006_p7 = scmp.lt.s32.totalorder %s997_s7, %s997_s7 }
  0x14   : > { %p988_p12 = pneg %p1226_p11  ;;  %p1007_p10 = por %p1006_p7, %p1005_p5 }
  0x16   : > { %p1000_p0 = pnand %p998_p13, %p988_p12 }
  0x18   : > { %p1001_p3 = pneg %p1000_p0 }
  0x1a   : > { %p1008_p9 = pnand %p1007_p10, %p1001_p3 }
  0x1c   : > { %1011 = shalt.err (!%p1008_p9)
}
  0x1d   : > { %s1138_s8 = smov 256   ;;  %s1139_s9 = smov 16  }
  0x1e   : > { %891 = dma.hbm_to_vmem [thread:$0]  (!%p1226_p11), %s1472_s1, 4096, %s176_s28, [#allocation6], %s1138_s8, %s1138_s8, %s1139_s9  }
  0x1f   : > { %s1023_s12 = scalar_lea.vmem %s192_s6, 4096  ;;  %p1031_p2 = scmp.lt.s32.totalorder %s192_s6, %s192_s6 }
  0x20   : > { %p1024_p1 = scmp.ne.s32.totalorder %s192_s6, %s1023_s12  ;;  %p1032_p6 = scmp.lt.s32.totalorder %s1023_s12, %s1023_s12 }
  0x22   : > { %p1026_p13 = pnand %p1024_p1, %p988_p12  ;;  %p1033_p5 = por %p1032_p6, %p1031_p2 }
  0x24   : > { %p1027_p0 = pneg %p1026_p13 }
  0x26   : > { %p1034_p10 = pnand %p1033_p5, %p1027_p0 }
  0x28   : > { %1037 = shalt.err (!%p1034_p10)
}
  0x29   : > { %s1478_s13 = smov 128   ;;  %s1141_s14 = smov 8  }
  0x2a   : > { %894 = dma.hbm_to_vmem [thread:$0]  (!%p1226_p11), %s1474_s3, 4096, %s192_s6, [#allocation6], %s1478_s13, %s1478_s13, %s1141_s14  }
  0x2b   : > { %s1252_s17 = sadd.s32 1, %s1134_s21   ;;  %s29_s27 = sadd.s32 1, %s1130_s20 }
  0x2c   : > { %s26_s23 = ssub.s32 %s1134_s21, %s1252_s17  ;;  %p36_p2 = scmp.ne.s32.totalorder %s1130_s20, %s1126_s19 }
  0x2d   : > { %p27_p1 = scmp.eq.s32.totalorder %s26_s23, 0  ;;  %p37_p6 = scmp.eq.s32.totalorder %s1134_s21, 0 }
  0x2e   : > { %p1486_p3 = scmp.eq.s32.totalorder %s1198_s22, 1  ;;  %p905_p9 = scmp.lt.s32.totalorder %s1134_s21, 2 }
  0x2f   : > { %s1261_s28 = scalar_select %p27_p1, %s1130_s20, %s29_s27  }
  0x30   : > { %p38_p12 = por %p37_p6, %p36_p2  ;;  %p1265_p7 = por %p1486_p3, %p36_p2 }
  0x31   : > { %s208_s30 = sand.u32 1, %s1130_s20   ;;  %s813_s6 = smul.u32 1152, %s1134_s21 }
  0x32   : > { %s1487_s29 = scalar_select %p1265_p7, 1, 0 }
  0x33   : > { %s874_s7 = smul.u32 72, %s208_s30  ;;  %p1272_p11 = pnand %p905_p9, %p38_p12 }
  0x34   : > { %s1279_s11 = scalar_lea.hbm %s1471_s0, %s813_s6  ;;  %s1283_s16 = scalar_lea.sflag [#allocation3], %s208_s30 }
  0x35   : > { %s212_s12 = scalar_lea.vmem [#allocation2], %s874_s7  ;;  %s1038_s23 = scalar_lea.hbm %s1279_s11, 1152 }
  0x36   : > { %s219_s15 = sshll.u32 %s212_s12, 4  ;;  %p1039_p13 = scmp.ne.s32.totalorder %s1279_s11, %s1038_s23  ;;  %s1281_s15 = int_to_ptr.vmem [resolvable:$true] %s219_s15 }
  0x37   : > { %p1040_p0 = pneg %p1272_p11  ;;  %s1043_s6 = scalar_lea.hbm %s1471_s0, 2304 }
  0x38   : > { %p1044_p1 = scmp.lt.s32.totalorder %s1279_s11, %s1471_s0  ;;  %p1045_p2 = scmp.lt.s32.totalorder %s1043_s6, %s1038_s23 }
  0x39   : > { %p1041_p5 = pnand %p1040_p0, %p1039_p13 }
  0x3a   : > { %p1046_p6 = por %p1045_p2, %p1044_p1 }
  0x3b   : > { %p1042_p10 = pneg %p1041_p5 }
  0x3d   : > { %p1047_p12 = pnand %p1046_p6, %p1042_p10 }
  0x3f   : > { %1050 = shalt.err (!%p1047_p12)
}
  0x40   : > { %s1051_s30 = scalar_lea.vmem %s1281_s15, 1152  ;;  %s1142_s7 = smov [#allocation2]  }
  0x41   : > { %p1052_p3 = scmp.ne.s32.totalorder %s1281_s15, %s1051_s30  ;;  %s1056_s12 = sshll.u32 %s1142_s7, 4  ;;  %s1057_s12 = int_to_ptr.vmem [resolvable:$false] %s1056_s12 }
  0x42   : > { %s1058_s27 = scalar_lea.vmem %s1057_s12, 2304  ;;  %p1059_p5 = scmp.lt.s32.totalorder %s1281_s15, %s1057_s12 }
  0x43   : > { %p1054_p9 = pnand %p1052_p3, %p1040_p0  ;;  %p1060_p7 = scmp.lt.s32.totalorder %s1058_s27, %s1051_s30 }
  0x45   : > { %p1055_p13 = pneg %p1054_p9  ;;  %p1061_p4 = por %p1060_p7, %p1059_p5 }
  0x47   : > { %p1062_p8 = pnand %p1061_p4, %p1055_p13 }
  0x49   : > { %1065 = shalt.err (!%p1062_p8)
}
  0x4a   : > { %s1489_s13 = smov 128   ;;  %p1490_p0 = scmp.ne.s32.totalorder %s1484_s26, 0 }
  0x4b   : > { %898 = dma.hbm_to_vmem [thread:$0]  (!%p1272_p11), %s1279_s11, 1152, %s1281_s15, %s1283_s16, %s1489_s13, %s1489_s13, %s1141_s14  }
  0x4c   : > { %231 = sbr.rel (%p1490_p0) target bundleno = 581 (0x245), region = 40  ;;  %s1310_s23 = sand.u32 (!%p1490_p0), 1, %s1126_s19  }
  0x4d   : > { %s875_s9 = smul.u32 (!%p1490_p0), 72, %s1310_s23  ;;  %s234_s6 = scalar_lea.sflag (!%p1490_p0), [#allocation3], %s1310_s23 }
  0x4e   : > { %p1491_p4 = scmp.ne.s32.totalorder (!%p1490_p0), %s1482_s24, 0 }
  0x4f   : > { %s1316_s8 = scalar_lea.vmem (!%p1490_p0), [#allocation2], %s875_s9 }
  0x51   : > { %1109 = dma.done.wait (%p1491_p4), %s234_s6, 1152  }
  0x52   : > { %1111 = vsyncadd (%p1491_p4), %s234_s6, 4294966144  ;;  %p1492_p8 = scmp.eq.s32.totalorder %s1198_s22, 0 }
  0x54   : > { %1113 = dma.done.wait (%p1492_p8), [#allocation6], 8192   ;;  %p1493_p7 = pmov %p1492_p8 }
  0x55   : > { %v1143_v0 = vmov 0.0   ;;  %v314_v1 = vld [vmem:[#allocation5 + $0xf8] sm:$0xff]  ;;  %v313_v2 = vld [vmem:[#allocation5 + $0xf0] sm:$0xff]  ;;  %v312_v3 = vld [vmem:[#allocation5 + $0xe8] sm:$0xff]  ;;  %s1410_s15 = scalar_lea.vmem [#allocation8], %s875_s9  ;;  %s814_s16 = smul.u32 1152, %s1198_s22 }
  0x56   : > { %1115 = vsyncadd (%p1493_p7), [#allocation6], 4294959104  ;;  %391 = vmatprep.mubr.f32.mxu0 %v1143_v0  ;;  %327 = vmatprep.subr.mxu0 %v314_v1  ;;  %v311_v4 = vld [vmem:[#allocation5 + $0xe0] sm:$0xff]  ;;  %v310_v5 = vld [vmem:[#allocation5 + $0xd8] sm:$0xff]  ;;  %s708_s10 = sshll.u32 %s1410_s15, 4  ;;  %s695_s27 = scalar_lea.sflag [#allocation4], %s1310_s23  ;;  %s1427_s10 = int_to_ptr.vmem [resolvable:$true] %s708_s10 }
  0x57   : > { %328 = vmatpush1.msra.mxu0 %v313_v2  ;;  %v309_v6 = vld [vmem:[#allocation5 + $0xd0] sm:$0xff]  ;;  %v308_v7 = vld [vmem:[#allocation5 + $0xc8] sm:$0xff]  ;;  %v307_v8 = vld [vmem:[#allocation5 + $0xc0] sm:$0xff]  ;;  %s1425_s12 = scalar_lea.hbm %s1476_s5, %s814_s16  ;;  %s1066_s13 = scalar_lea.vmem %s1427_s10, 1152 }
  0x58   : > { %329 = vmatprep.subr.mxu0 %v312_v3  ;;  %v306_v9 = vld [vmem:[#allocation5 + $0xb8] sm:$0xff]  ;;  %v305_v10 = vld [vmem:[#allocation5 + $0xb0] sm:$0xff]  ;;  %v304_v11 = vld [vmem:[#allocation5 + $0xa8] sm:$0xff]  ;;  %p1067_p11 = scmp.ne.s32.totalorder %s1427_s10, %s1066_s13  ;;  %p1494_p10 = scmp.ne.s32.totalorder %s1487_s29, 0 }
  0x59   : > { %330 = vmatpush1.msra.mxu0 %v311_v4  ;;  %v303_v12 = vld [vmem:[#allocation5 + $0xa0] sm:$0xff]  ;;  %v302_v13 = vld [vmem:[#allocation5 + $0x98] sm:$0xff]  ;;  %v301_v14 = vld [vmem:[#allocation5 + $0x90] sm:$0xff]  ;;  %s1144_s22 = smov [#allocation8]  }
  0x5a   : > { %331 = vmatprep.subr.mxu0 %v310_v5  ;;  %v300_v15 = vld [vmem:[#allocation5 + $0x88] sm:$0xff]  ;;  %v299_v16 = vld [vmem:[#allocation5 + $0x80] sm:$0xff]  ;;  %v298_v17 = vld [vmem:[#allocation5 + $0x78] sm:$0xff]  ;;  %p1068_p1 = pnand %p1067_p11, %p1494_p10  ;;  %s1070_s9 = sshll.u32 %s1144_s22, 4  ;;  %s1071_s9 = int_to_ptr.vmem [resolvable:$false] %s1070_s9 }
  0x5b   : > { %332 = vmatpush1.msra.mxu0 %v309_v6  ;;  %v567_v18 = vld [vmem:[#allocation7 + $0xf8] sm:$0xff]  ;;  %v566_v20 = vld [vmem:[#allocation7 + $0xf0] sm:$0xff]  ;;  %v565_v23 = vld [vmem:[#allocation7 + $0xe8] sm:$0xff]  ;;  %s1072_s6 = scalar_lea.vmem %s1071_s9, 2304  ;;  %p1073_p6 = scmp.lt.s32.totalorder %s1427_s10, %s1071_s9 }
  0x5c   : > { %333 = vmatprep.subr.mxu0 %v308_v7  ;;  %815 = vmatprep.subr.mxu1 %v567_v18  ;;  %v551_v19 = vld [vmem:[#allocation7 + $0x78] sm:$0xff]  ;;  %v550_v21 = vld [vmem:[#allocation7 + $0x70] sm:$0xff]  ;;  %v296_v24 = vld [vmem:[#allocation5 + $0x68] sm:$0xff]  ;;  %p1069_p2 = pneg %p1068_p1  ;;  %p1074_p12 = scmp.lt.s32.totalorder %s1072_s6, %s1066_s13 }
  0x5d   : > { %334 = vmatpush1.msra.mxu0 %v307_v8  ;;  %v297_v22 = vld [vmem:[#allocation5 + $0x70] sm:$0xff]  ;;  %816 = vmatpush3.msra.mxu1 %v551_v19  ;;  %v549_v25 = vld [vmem:[#allocation7 + $0x68] sm:$0xff]  ;;  %v295_v26 = vld [vmem:[#allocation5 + $0x60] sm:$0xff] }
  0x5e   : > { %335 = vmatprep.subr.mxu0 %v306_v9  ;;  %817 = vmatprep.subr.mxu1 %v566_v20  ;;  %v294_v27 = vld [vmem:[#allocation5 + $0x58] sm:$0xff]  ;;  %v293_v28 = vld [vmem:[#allocation5 + $0x50] sm:$0xff]  ;;  %v292_v29 = vld [vmem:[#allocation5 + $0x48] sm:$0xff]  ;;  %p1075_p3 = por %p1074_p12, %p1073_p6 }
  0x5f   : > { %336 = vmatpush1.msra.mxu0 %v305_v10  ;;  %818 = vmatpush3.msra.mxu1 %v550_v21  ;;  %v291_v30 = vld [vmem:[#allocation5 + $0x40] sm:$0xff]  ;;  %v290_v31 = vld [vmem:[#allocation5 + $0x38] sm:$0xff]  ;;  %v289_v32 = vld [vmem:[#allocation5 + $0x30] sm:$0xff]  ;;  %v317_v10 = vlaneseq }
  0x60   : > { %337 = vmatprep.subr.mxu0 %v304_v11  ;;  %819 = vmatprep.subr.mxu1 %v565_v23  ;;  %v288_v33 = vld [vmem:[#allocation5 + $0x28] sm:$0xff]  ;;  %v287_v34 = vld [vmem:[#allocation5 + $0x20] sm:$0xff]  ;;  %v286_v35 = vld [vmem:[#allocation5 + $0x18] sm:$0xff]  ;;  %p1076_p9 = pnand %p1075_p3, %p1069_p2 }
  0x61   : > { %338 = vmatpush1.msra.mxu0 %v303_v12  ;;  %820 = vmatpush3.msra.mxu1 %v549_v25  ;;  %v285_v36 = vld [vmem:[#allocation5 + $0x10] sm:$0xff]  ;;  %v284_v37 = vld [vmem:[#allocation5 + $0x8] sm:$0xff]  ;;  %v283_v38 = vld [vmem:[#allocation5] sm:$0xff]  ;;  %v318_v11 = vshrl.u32 %v317_v10, 7 }
  0x62   : > { %339 = vmatprep.subr.mxu0 %v302_v13  ;;  %v274_v39 = vld [vmem:[%s1316_s8] sm:$0xff]  ;;  %v275_v40 = vld [vmem:[%s1316_s8 + $0x8] sm:$0xff]  ;;  %v276_v41 = vld [vmem:[%s1316_s8 + $0x10] sm:$0xff] }
  0x63   : > { %340 = vmatpush1.msra.mxu0 %v301_v14  ;;  %v277_v42 = vld [vmem:[%s1316_s8 + $0x18] sm:$0xff]  ;;  %v278_v43 = vld [vmem:[%s1316_s8 + $0x20] sm:$0xff]  ;;  %v279_v44 = vld [vmem:[%s1316_s8 + $0x28] sm:$0xff]  ;;  %v319_v12 = vsub.s32 0, %v318_v11  ;;  %v323_v14 = vsub.s32 1, %v318_v11 }
  0x64   : > { %341 = vmatprep.subr.mxu0 %v300_v15  ;;  %v280_v45 = vld [vmem:[%s1316_s8 + $0x30] sm:$0xff]  ;;  %v281_v46 = vld [vmem:[%s1316_s8 + $0x38] sm:$0xff]  ;;  %v282_v47 = vld [vmem:[%s1316_s8 + $0x40] sm:$0xff] }
  0x65   : > { %342 = vmatpush1.msra.mxu0 %v299_v16  ;;  %v564_v48 = vld [vmem:[#allocation7 + $0xe0] sm:$0xff]  ;;  %v563_v50 = vld [vmem:[#allocation7 + $0xd8] sm:$0xff]  ;;  %v562_v52 = vld [vmem:[#allocation7 + $0xd0] sm:$0xff] }
  0x66   : > { %343 = vmatprep.subr.mxu0 %v298_v17  ;;  %821 = vmatprep.subr.mxu1 %v564_v48  ;;  %v548_v49 = vld [vmem:[#allocation7 + $0x60] sm:$0xff]  ;;  %v547_v51 = vld [vmem:[#allocation7 + $0x58] sm:$0xff]  ;;  %v546_v53 = vld [vmem:[#allocation7 + $0x50] sm:$0xff] }
  0x67   : > { %344 = vmatpush1.msra.mxu0 %v297_v22  ;;  %822 = vmatpush3.msra.mxu1 %v548_v49  ;;  %v561_v54 = vld [vmem:[#allocation7 + $0xc8] sm:$0xff]  ;;  %v560_v56 = vld [vmem:[#allocation7 + $0xc0] sm:$0xff]  ;;  %v559_v58 = vld [vmem:[#allocation7 + $0xb8] sm:$0xff] }
  0x68   : > { %345 = vmatprep.subr.mxu0 %v296_v24  ;;  %823 = vmatprep.subr.mxu1 %v563_v50  ;;  %v545_v55 = vld [vmem:[#allocation7 + $0x48] sm:$0xff]  ;;  %v544_v57 = vld [vmem:[#allocation7 + $0x40] sm:$0xff]  ;;  %v543_v59 = vld [vmem:[#allocation7 + $0x38] sm:$0xff] }
  0x69   : > { %346 = vmatpush1.msra.mxu0 %v295_v26  ;;  %824 = vmatpush3.msra.mxu1 %v547_v51  ;;  %v558_v60 = vld [vmem:[#allocation7 + $0xb0] sm:$0xff]  ;;  %v557_v62 = vld [vmem:[#allocation7 + $0xa8] sm:$0xff]  ;;  %v540_v1 = vld [vmem:[#allocation7 + $0x20] sm:$0xff] }
  0x6a   : > { %347 = vmatprep.subr.mxu0 %v294_v27  ;;  %825 = vmatprep.subr.mxu1 %v562_v52  ;;  %v542_v61 = vld [vmem:[#allocation7 + $0x30] sm:$0xff]  ;;  %v541_v63 = vld [vmem:[#allocation7 + $0x28] sm:$0xff]  ;;  %v555_v2 = vld [vmem:[#allocation7 + $0x98] sm:$0xff] }
  0x6b   : > { %348 = vmatpush1.msra.mxu0 %v293_v28  ;;  %826 = vmatpush3.msra.mxu1 %v546_v53  ;;  %v539_v3 = vld [vmem:[#allocation7 + $0x18] sm:$0xff]  ;;  %v554_v4 = vld [vmem:[#allocation7 + $0x90] sm:$0xff]  ;;  %v553_v6 = vld [vmem:[#allocation7 + $0x88] sm:$0xff] }
  0x6c   : > { %349 = vmatprep.subr.mxu0 %v292_v29  ;;  %827 = vmatprep.subr.mxu1 %v561_v54  ;;  %v538_v5 = vld [vmem:[#allocation7 + $0x10] sm:$0xff]  ;;  %v537_v7 = vld [vmem:[#allocation7 + $0x8] sm:$0xff]  ;;  %v552_v8 = vld [vmem:[#allocation7 + $0x80] sm:$0xff] }
  0x6d   : > { %350 = vmatpush1.msra.mxu0 %v291_v30  ;;  %828 = vmatpush3.msra.mxu1 %v545_v55  ;;  %v536_v9 = vld [vmem:[#allocation7] sm:$0xff]  ;;  %v315_v13 = vld [vmem:[%s1473_s2] sm:$0x3] }
  0x6e   : > { %351 = vmatprep.subr.mxu0 %v290_v31  ;;  %829 = vmatprep.subr.mxu1 %v560_v56  ;;  %v1347_v15 = vrot.slane %v315_v13, %v319_v12  ;;  %v1349_v16 = vrot.slane %v315_v13, %v323_v14 }
  0x6f   : > { %352 = vmatpush1.msra.mxu0 %v289_v32  ;;  %830 = vmatpush3.msra.mxu1 %v544_v57 }
  0x70   : > { %353 = vmatprep.subr.mxu0 %v288_v33  ;;  %831 = vmatprep.subr.mxu1 %v559_v58 }
  0x71   : > { %354 = vmatpush1.msra.mxu0 %v287_v34  ;;  %832 = vmatpush3.msra.mxu1 %v543_v59 }
  0x72   : > { %355 = vmatprep.subr.mxu0 %v286_v35  ;;  %833 = vmatprep.subr.mxu1 %v558_v60 }
  0x73   : > { %356 = vmatpush1.msra.mxu0 %v285_v36  ;;  %834 = vmatpush3.msra.mxu1 %v542_v61 }
  0x74   : > { %357 = vmatprep.subr.mxu0 %v284_v37  ;;  %835 = vmatprep.subr.mxu1 %v557_v62 }
  0x75   : > { %358 = vmatpush1.msra.mxu0 %v283_v38  ;;  %836 = vmatpush3.msra.mxu1 %v541_v63 }
  0x76   : > { %392 = vmatmul.mubr.f32.vlgmr.msra.gmra.mxu0 %v274_v39 }
  0x77   : > { %397 = vmatprep.mubr.f32.mxu0 %v1143_v0 }
  0x7a   : > { %398 = vmatmul.mubr.f32.gmra.mxu0 %v275_v40 }
  0x7b   : > { %403 = vmatprep.mubr.f32.mxu0 %v1143_v0 }
  0x7e   : > { %404 = vmatmul.mubr.f32.gmra.mxu0 %v276_v41 }
  0x7f   : > { %409 = vmatprep.mubr.f32.mxu0 %v1143_v0 }
  0x82   : > { %410 = vmatmul.mubr.f32.gmra.mxu0 %v277_v42 }
  0x83   : > { %415 = vmatprep.mubr.f32.mxu0 %v1143_v0 }
  0x86   : > { %416 = vmatmul.mubr.f32.gmra.mxu0 %v278_v43 }
  0x87   : > { %421 = vmatprep.mubr.f32.mxu0 %v1143_v0 }
  0x8a   : > { %422 = vmatmul.mubr.f32.gmra.mxu0 %v279_v44 }
  0x8b   : > { %427 = vmatprep.mubr.f32.mxu0 %v1143_v0 }
  0x8e   : > { %428 = vmatmul.mubr.f32.gmra.mxu0 %v280_v45 }
  0x8f   : > { %433 = vmatprep.mubr.f32.mxu0 %v1143_v0 }
  0x92   : > { %434 = vmatmul.mubr.f32.gmra.mxu0 %v281_v46 }
  0x93   : > { %439 = vmatprep.mubr.f32.mxu0 %v1143_v0  ;;  %v556_v0 = vld [vmem:[#allocation7 + $0xa0] sm:$0xff] }
  0x94   : > { %837 = vmatprep.subr.mxu1 %v556_v0 }
  0x95   : > { %838 = vmatpush3.msra.mxu1 %v540_v1 }
  0x96   : > { %440 = vmatmul.mubr.f32.gmra.mxu0 %v282_v47  ;;  %839 = vmatprep.subr.mxu1 %v555_v2 }
  0x97   : > { %840 = vmatpush3.msra.mxu1 %v539_v3 }
  0x98   : > { %841 = vmatprep.subr.mxu1 %v554_v4 }
  0x99   : > { %842 = vmatpush3.msra.mxu1 %v538_v5 }
  0x9a   : > { %843 = vmatprep.subr.mxu1 %v553_v6 }
  0x9b   : > { %844 = vmatpush3.msra.mxu1 %v537_v7 }
  0x9c   : > { %845 = vmatprep.subr.mxu1 %v552_v8 }
  0x9d   : > { %846 = vmatpush3.msra.mxu1 %v536_v9 }
 0x136   : > { %v393_v17 = vpop.f32.mrf.mxu0 }
 0x137   : > { %v394_v18 = vadd.f32 %v393_v17, %v1347_v15 }
 0x138   : > { %v395_v19 = vpop.f32.mrf.mxu0 }
 0x139   : > { %v464_v20 = vmul.f32 0.70710677, %v394_v18  ;;  %v396_v21 = vadd.f32 %v395_v19, %v1349_v16  ;;  %v446_v56 = vmul.f32 0.5, %v394_v18 }
 0x13a   : > { %v399_v22 = vpop.f32.mrf.mxu0 }
 0x13b   : > { %950 = verf.f32 %v464_v20  ;;  %v465_v23 = vmul.f32 0.70710677, %v396_v21  ;;  %v400_v24 = vadd.f32 %v399_v22, %v1347_v15  ;;  %v447_v54 = vmul.f32 0.5, %v396_v21 }
 0x13c   : > { %v401_v25 = vpop.f32.mrf.mxu0 }
 0x13d   : > { %952 = verf.f32 %v465_v23  ;;  %v466_v26 = vmul.f32 0.70710677, %v400_v24  ;;  %v402_v27 = vadd.f32 %v401_v25, %v1349_v16  ;;  %v448_v3 = vmul.f32 0.5, %v400_v24 }
 0x13e   : > { %v405_v28 = vpop.f32.mrf.mxu0 }
 0x13f   : > { %954 = verf.f32 %v466_v26  ;;  %v467_v29 = vmul.f32 0.70710677, %v402_v27  ;;  %v1356_v30 = vadd.f32 %v405_v28, %v1347_v15  ;;  %v449_v4 = vmul.f32 0.5, %v402_v27 }
 0x140   : > { %v407_v31 = vpop.f32.mrf.mxu0 }
 0x141   : > { %956 = verf.f32 %v467_v29  ;;  %v468_v32 = vmul.f32 0.70710677, %v1356_v30  ;;  %v408_v33 = vadd.f32 %v407_v31, %v1349_v16  ;;  %v450_v22 = vmul.f32 0.5, %v1356_v30 }
 0x142   : > { %v411_v34 = vpop.f32.mrf.mxu0 }
 0x143   : > { %958 = verf.f32 %v468_v32  ;;  %v469_v35 = vmul.f32 0.70710677, %v408_v33  ;;  %v1361_v36 = vadd.f32 %v411_v34, %v1347_v15  ;;  %v451_v19 = vmul.f32 0.5, %v408_v33 }
 0x144   : > { %v413_v37 = vpop.f32.mrf.mxu0 }
 0x145   : > { %960 = verf.f32 %v469_v35  ;;  %v470_v38 = vmul.f32 0.70710677, %v1361_v36  ;;  %v1365_v39 = vadd.f32 %v413_v37, %v1349_v16  ;;  %v452_v34 = vmul.f32 0.5, %v1361_v36 }
 0x146   : > { %v417_v40 = vpop.f32.mrf.mxu0 }
 0x147   : > { %962 = verf.f32 %v470_v38  ;;  %v471_v41 = vmul.f32 0.70710677, %v1365_v39  ;;  %v1369_v42 = vadd.f32 %v417_v40, %v1347_v15  ;;  %v453_v30 = vmul.f32 0.5, %v1365_v39 }
 0x148   : > { %v951_v43 = vpop.eup %950  ;;  %v419_v44 = vpop.f32.mrf.mxu0 }
 0x149   : > { %964 = verf.f32 %v471_v41  ;;  %v472_v45 = vmul.f32 0.70710677, %v1369_v42  ;;  %v1373_v46 = vadd.f32 %v419_v44, %v1349_v16  ;;  %v500_v51 = vadd.f32 1.0, %v951_v43 }
 0x14a   : > { %v953_v47 = vpop.eup %952  ;;  %v423_v48 = vpop.f32.mrf.mxu0  ;;  %v454_v39 = vmul.f32 0.5, %v1369_v42 }
 0x14b   : > { %966 = verf.f32 %v472_v45  ;;  %v473_v49 = vmul.f32 0.70710677, %v1373_v46  ;;  %v1377_v50 = vadd.f32 %v423_v48, %v1347_v15  ;;  %v501_v55 = vadd.f32 1.0, %v953_v47 }
 0x14c   : > { %v955_v52 = vpop.eup %954  ;;  %v425_v53 = vpop.f32.mrf.mxu0  ;;  %v518_v1 = vmul.f32 %v500_v51, %v446_v56  ;;  %v455_v43 = vmul.f32 0.5, %v1373_v46 }
 0x14d   : > { %968 = verf.f32 %v473_v49  ;;  %v474_v57 = vmul.f32 0.70710677, %v1377_v50  ;;  %v1381_v58 = vadd.f32 %v425_v53, %v1349_v16  ;;  %v519_v61 = vmul.f32 %v501_v55, %v447_v54 }
 0x14e   : > { %v957_v59 = vpop.eup %956  ;;  %v429_v60 = vpop.f32.mrf.mxu0  ;;  %v502_v62 = vadd.f32 1.0, %v955_v52  ;;  %v456_v55 = vmul.f32 0.5, %v1377_v50 }
 0x14f   : > { %970 = verf.f32 %v474_v57  ;;  %v475_v63 = vmul.f32 0.70710677, %v1381_v58  ;;  %v1385_v0 = vadd.f32 %v429_v60, %v1347_v15  ;;  %639 = vmatprep.mubr.f32.mxu1 %v519_v61  ;;  %v503_v6 = vadd.f32 1.0, %v957_v59 }
 0x150   : > { %v959_v2 = vpop.eup %958  ;;  %v431_v5 = vpop.f32.mrf.mxu0  ;;  %640 = vmatmul.mubr.f32.vlgmr.msra.gmra.mxu1 %v518_v1  ;;  %v520_v12 = vmul.f32 %v502_v62, %v448_v3 }
 0x151   : > { %972 = verf.f32 %v475_v63  ;;  %v476_v7 = vmul.f32 0.70710677, %v1385_v0  ;;  %v432_v8 = vadd.f32 %v431_v5, %v1349_v16  ;;  %v521_v11 = vmul.f32 %v503_v6, %v449_v4 }
 0x152   : > { %v961_v9 = vpop.eup %960  ;;  %v435_v10 = vpop.f32.mrf.mxu0  ;;  %v504_v17 = vadd.f32 1.0, %v959_v2  ;;  %v458_v63 = vmul.f32 0.5, %v1385_v0 }
 0x153   : > { %974 = verf.f32 %v476_v7  ;;  %v477_v13 = vmul.f32 0.70710677, %v432_v8  ;;  %v1390_v14 = vadd.f32 %v435_v10, %v1347_v15  ;;  %644 = vmatprep.mubr.f32.mxu1 %v521_v11  ;;  %v505_v21 = vadd.f32 1.0, %v961_v9 }
 0x154   : > { %v963_v18 = vpop.eup %962  ;;  %v437_v20 = vpop.f32.mrf.mxu0  ;;  %645 = vmatmul.mubr.f32.gmra.mxu1 %v520_v12  ;;  %v522_v32 = vmul.f32 %v504_v17, %v450_v22  ;;  %v459_v59 = vmul.f32 0.5, %v432_v8 }
 0x155   : > { %976 = verf.f32 %v477_v13  ;;  %v478_v23 = vmul.f32 0.70710677, %v1390_v14  ;;  %v438_v24 = vadd.f32 %v437_v20, %v1349_v16  ;;  %v523_v27 = vmul.f32 %v505_v21, %v451_v19 }
 0x156   : > { %v965_v25 = vpop.eup %964  ;;  %v441_v26 = vpop.f32.mrf.mxu0  ;;  %v506_v28 = vadd.f32 1.0, %v963_v18  ;;  %v460_v6 = vmul.f32 0.5, %v1390_v14  ;;  %v809_v14 = vld [vmem:[%s1475_s4] ss:$0 sm:$0xff] }
 0x157   : > { %978 = verf.f32 %v478_v23  ;;  %v479_v29 = vmul.f32 0.70710677, %v438_v24  ;;  %v442_v31 = vadd.f32 %v441_v26, %v1347_v15  ;;  %649 = vmatprep.mubr.f32.mxu1 %v523_v27  ;;  %v507_v37 = vadd.f32 1.0, %v965_v25 }
 0x158   : > { %v967_v33 = vpop.eup %966  ;;  %v443_v35 = vpop.f32.mrf.mxu0  ;;  %650 = vmatmul.mubr.f32.gmra.mxu1 %v522_v32  ;;  %v524_v45 = vmul.f32 %v506_v28, %v452_v34  ;;  %v461_v2 = vmul.f32 0.5, %v438_v24 }
 0x159   : > { %980 = verf.f32 %v479_v29  ;;  %v480_v38 = vmul.f32 0.70710677, %v442_v31  ;;  %v444_v40 = vadd.f32 %v443_v35, %v1349_v16  ;;  %v525_v44 = vmul.f32 %v507_v37, %v453_v30 }
 0x15a   : > { %v969_v41 = vpop.eup %968  ;;  %v508_v48 = vadd.f32 1.0, %v967_v33  ;;  %v457_v16 = vmul.f32 0.5, %v1381_v58  ;;  %v462_v12 = vmul.f32 0.5, %v442_v31 }
 0x15b   : > { %982 = verf.f32 %v480_v38  ;;  %v481_v15 = vmul.f32 0.70710677, %v444_v40  ;;  %v509_v47 = vadd.f32 1.0, %v969_v41  ;;  %654 = vmatprep.mubr.f32.mxu1 %v525_v44  ;;  %v463_v9 = vmul.f32 0.5, %v444_v40 }
 0x15c   : > { %v971_v36 = vpop.eup %970  ;;  %655 = vmatmul.mubr.f32.gmra.mxu1 %v524_v45  ;;  %v526_v52 = vmul.f32 %v508_v48, %v454_v39 }
 0x15d   : > { %984 = verf.f32 %v481_v15  ;;  %v527_v49 = vmul.f32 %v509_v47, %v455_v43  ;;  %v510_v46 = vadd.f32 1.0, %v971_v36 }
 0x15e   : > { %v973_v51 = vpop.eup %972 }
 0x15f   : > { %659 = vmatprep.mubr.f32.mxu1 %v527_v49  ;;  %v511_v53 = vadd.f32 1.0, %v973_v51  ;;  %v528_v60 = vmul.f32 %v510_v46, %v456_v55 }
 0x160   : > { %v975_v54 = vpop.eup %974  ;;  %660 = vmatmul.mubr.f32.gmra.mxu1 %v526_v52 }
 0x161   : > { %v529_v56 = vmul.f32 %v511_v53, %v457_v16  ;;  %v512_v61 = vadd.f32 1.0, %v975_v54 }
 0x162   : > { %v977_v57 = vpop.eup %976 }
 0x163   : > { %664 = vmatprep.mubr.f32.mxu1 %v529_v56  ;;  %v513_v42 = vadd.f32 1.0, %v977_v57  ;;  %v530_v3 = vmul.f32 %v512_v61, %v458_v63 }
 0x164   : > { %v979_v62 = vpop.eup %978  ;;  %665 = vmatmul.mubr.f32.gmra.mxu1 %v528_v60 }
 0x165   : > { %v531_v58 = vmul.f32 %v513_v42, %v459_v59  ;;  %v514_v5 = vadd.f32 1.0, %v979_v62 }
 0x166   : > { %v981_v1 = vpop.eup %980 }
 0x167   : > { %669 = vmatprep.mubr.f32.mxu1 %v531_v58  ;;  %v515_v4 = vadd.f32 1.0, %v981_v1  ;;  %v532_v10 = vmul.f32 %v514_v5, %v460_v6 }
 0x168   : > { %v983_v50 = vpop.eup %982  ;;  %670 = vmatmul.mubr.f32.gmra.mxu1 %v530_v3 }
 0x169   : > { %v533_v7 = vmul.f32 %v515_v4, %v461_v2  ;;  %v516_v0 = vadd.f32 1.0, %v983_v50 }
 0x16a   : > { %v985_v8 = vpop.eup %984 }
 0x16b   : > { %674 = vmatprep.mubr.f32.mxu1 %v533_v7  ;;  %v517_v11 = vadd.f32 1.0, %v985_v8  ;;  %v534_v17 = vmul.f32 %v516_v0, %v462_v12 }
 0x16c   : > { %675 = vmatmul.mubr.f32.gmra.mxu1 %v532_v10 }
 0x16d   : > { %v535_v13 = vmul.f32 %v517_v11, %v463_v9 }
 0x16f   : > { %679 = vmatprep.mubr.f32.mxu1 %v535_v13 }
 0x170   : > { %680 = vmatmul.mubr.f32.gmra.mxu1 %v534_v17 }
 0x210   : > { %v847_v18 = vpop.f32.mrf.mxu1 }
 0x212   : > { %v848_v19 = vpop.f32.mrf.mxu1 }
 0x213   : > { %v849_v20 = vadd.f32 %v848_v19, %v847_v18 }
 0x214   : > { %v850_v21 = vpop.f32.mrf.mxu1 }
 0x215   : > { %v642_v22 = vadd.f32 %v849_v20, %v809_v14 }
 0x216   : > { %v851_v23 = vpop.f32.mrf.mxu1 }
 0x217   : > { %685 = vst [vmem:[%s1410_s15] sm:$0xff] %v642_v22  ;;  %v852_v24 = vadd.f32 %v851_v23, %v850_v21 }
 0x218   : > { %v853_v25 = vpop.f32.mrf.mxu1 }
 0x219   : > { %v647_v26 = vadd.f32 %v852_v24, %v809_v14 }
 0x21a   : > { %v854_v27 = vpop.f32.mrf.mxu1 }
 0x21b   : > { %686 = vst [vmem:[%s1410_s15 + $0x8] sm:$0xff] %v647_v26  ;;  %v855_v28 = vadd.f32 %v854_v27, %v853_v25 }
 0x21c   : > { %v856_v29 = vpop.f32.mrf.mxu1 }
 0x21d   : > { %v652_v31 = vadd.f32 %v855_v28, %v809_v14 }
 0x21e   : > { %v857_v32 = vpop.f32.mrf.mxu1 }
 0x21f   : > { %687 = vst [vmem:[%s1410_s15 + $0x10] sm:$0xff] %v652_v31  ;;  %v858_v33 = vadd.f32 %v857_v32, %v856_v29 }
 0x220   : > { %v859_v34 = vpop.f32.mrf.mxu1 }
 0x221   : > { %v657_v30 = vadd.f32 %v858_v33, %v809_v14 }
 0x222   : > { %v860_v35 = vpop.f32.mrf.mxu1 }
 0x223   : > { %688 = vst [vmem:[%s1410_s15 + $0x18] sm:$0xff] %v657_v30  ;;  %v861_v37 = vadd.f32 %v860_v35, %v859_v34 }
 0x224   : > { %v862_v38 = vpop.f32.mrf.mxu1 }
 0x225   : > { %v662_v40 = vadd.f32 %v861_v37, %v809_v14 }
 0x226   : > { %v863_v41 = vpop.f32.mrf.mxu1 }
 0x227   : > { %689 = vst [vmem:[%s1410_s15 + $0x20] sm:$0xff] %v662_v40  ;;  %v864_v43 = vadd.f32 %v863_v41, %v862_v38 }
 0x228   : > { %v865_v44 = vpop.f32.mrf.mxu1 }
 0x229   : > { %v667_v45 = vadd.f32 %v864_v43, %v809_v14 }
 0x22a   : > { %v866_v15 = vpop.f32.mrf.mxu1 }
 0x22b   : > { %690 = vst [vmem:[%s1410_s15 + $0x28] sm:$0xff] %v667_v45  ;;  %v867_v47 = vadd.f32 %v866_v15, %v865_v44 }
 0x22c   : > { %v868_v48 = vpop.f32.mrf.mxu1 }
 0x22d   : > { %v672_v36 = vadd.f32 %v867_v47, %v809_v14 }
 0x22e   : > { %v869_v39 = vpop.f32.mrf.mxu1 }
 0x22f   : > { %691 = vst [vmem:[%s1410_s15 + $0x30] sm:$0xff] %v672_v36  ;;  %v870_v49 = vadd.f32 %v869_v39, %v868_v48 }
 0x230   : > { %v871_v51 = vpop.f32.mrf.mxu1 }
 0x231   : > { %v677_v16 = vadd.f32 %v870_v49, %v809_v14 }
 0x232   : > { %v872_v52 = vpop.f32.mrf.mxu1 }
 0x233   : > { %692 = vst [vmem:[%s1410_s15 + $0x38] sm:$0xff] %v677_v16  ;;  %v873_v53 = vadd.f32 %v872_v52, %v871_v51 }
 0x235   : > { %v682_v46 = vadd.f32 %v873_v53, %v809_v14 }
 0x237   : > { %693 = vst [vmem:[%s1410_s15 + $0x40] sm:$0xff] %v682_v46 }
 0x238   : > { %1079 = shalt.err (!%p1076_p9)
}
 0x239   : > { %s1080_s8 = scalar_lea.hbm %s1425_s12, 1152  ;;  %s1084_s14 = scalar_lea.hbm %s1476_s5, 2304 }
 0x23a   : > { %p1081_p13 = scmp.ne.s32.totalorder %s1425_s12, %s1080_s8  ;;  %p1085_p4 = scmp.lt.s32.totalorder %s1425_s12, %s1476_s5 }
 0x23b   : > { %p1086_p8 = scmp.lt.s32.totalorder %s1084_s14, %s1080_s8 }
 0x23c   : > { %p1082_p5 = pnand %p1081_p13, %p1494_p10 }
 0x23d   : > { %p1087_p7 = por %p1086_p8, %p1085_p4 }
 0x23e   : > { %p1083_p0 = pneg %p1082_p5 }
 0x240   : > { %p1088_p11 = pnand %p1087_p7, %p1083_p0 }
 0x242   : > { %1091 = shalt.err (!%p1088_p11)
}
 0x243   : > { %s1145_s16 = smov 128   ;;  %s1146_s30 = smov 8  }
 0x244   : > { %886 = dma.vmem_to_hbm [thread:$0]  (%p1494_p10), %s1427_s10, 1152, %s1425_s12, %s695_s27, %s1145_s16, %s1145_s16, %s1146_s30  }
 0x245 PF: > { %s723_s7 = sand.u32 1, %s1122_s18   ;;  %p1495_p1 = scmp.ne.s32.totalorder %s1483_s25, 0 }
 0x246   : > { %p1496_p2 = scmp.ge.s32.totalorder %s1134_s21, 2  ;;  %s724_s13 = scalar_lea.sflag [#allocation4], %s723_s7 }
 0x248   : > { %p900_p6 = pnand %p1496_p2, %p1495_p1 }
 0x24a   : > { %p901_p12 = pneg %p900_p6 }
 0x24c   : > { %1117 = dma.done.wait (%p901_p12), %s724_s13, 1152  }
 0x24d   : > { %1119 = vsyncadd (%p901_p12), %s724_s13, 4294966144  ;;  %p19_p3 = scmp.ge.s32.totalorder %s1252_s17, 4   ;;  %s1497_s18 = smov %s1126_s19 }
 0x24e   : > { %s1498_s19 = smov %s1130_s20  ;;  %s1499_s20 = smov %s1261_s28 }
 0x24f   : > { %s1500_s21 = smov %s1252_s17  ;;  %21 = sbr.rel (!%p19_p3) target bundleno = 6 (0x6), region = 93 }
 0x254   :  { %729 = vsyncpa [#allocation3], 1 }
 0x255   :  { %731 = vsyncpa [#allocation3 + $0x1], 1 }
 0x256   :  { %732 = vsyncpa [#allocation6], 1 }
 0x257   :  { %733 = vsyncpa [#allocation4], 1 }
 0x258   :  { %735 = vsyncpa [#allocation4 + $0x1], 1 }

</bundles_post_ra>
